<compile_context>
chip_gen: v7x
topology: tpu7x:2x2x1
jax: 0.10.0
libtpu: 0.0.40
codegen_flags: <defaults>
</compile_context>

<pallas_src>
import functools

import jax
import jax.numpy as jnp
from jax import lax
from jax.experimental import pallas as pl
from jax.experimental.pallas import tpu as pltpu


# --------------------------------------------------------------------------
# One fused kernel for the whole MultiHeadAttention forward.
# --------------------------------------------------------------------------
def _mha_fused_kernel(q_ref, k_ref, v_ref,
                      wq_ref, bq_ref, wk_ref, bk_ref,
                      wfc_ref, bfc_ref, gamma_ref, beta_ref,
                      out_ref, *rest,
                      n_heads, sz_b, len_q, len_k, dk, dv,
                      mxu_dtype, return_attn, approx_reciprocal):
    if return_attn:
        attn_ref, scores_ref, heads_ref = rest
    else:
        attn_ref = None
        scores_ref, heads_ref = rest

    f32 = jnp.float32

    def to_mxu(x):
        # Cast ONCE per tensor (hoisted out of the unrolled loops). With the
        # default mxu_dtype=float32 this is a no-op and no casts are emitted.
        return x if x.dtype == mxu_dtype else x.astype(mxu_dtype)

    def mm(x, w, contract=(1, 0)):
        # MXU matmul with f32 accumulation; transposed contraction avoids any
        # materialized `.T` / XLU transpose.
        return lax.dot_general(
            x, w,
            dimension_numbers=(((contract[0],), (contract[1],)), ((), ())),
            preferred_element_type=f32)

    # ---- load inputs / weights and cast once ----
    q2d = q_ref[...]                            # (Mq, D) f32; also the residual
    q_in = to_mxu(q2d)
    k_in = to_mxu(k_ref[...])
    v_in = to_mxu(v_ref[...])
    wq = to_mxu(wq_ref[...])
    wk = to_mxu(wk_ref[...])
    wfc = to_mxu(wfc_ref[...])

    # ---- Q/K/V projections: 3 full-width MXU matmuls ----
    q_p = mm(q_in, wq) + bq_ref[...]            # (Mq, H*dk)
    k_p = mm(k_in, wk) + bk_ref[...]            # (Mk, H*dk)
    # Reference bug (reproduced): V is projected with w_ks / b_ks.
    v_p = mm(v_in, wk) + bk_ref[...]            # (Mk, H*dv)

    q_pm = to_mxu(q_p)
    k_pm = to_mxu(k_p)
    v_pm = to_mxu(v_p)

    # ---- per-(head, batch) score tiles, stacked on the sublane axis ----
    # Row block (h*sz_b + b) of scores_ref matches the reference attn layout.
    for h in range(n_heads):
        for b in range(sz_b):
            qb = q_pm[b * len_q:(b + 1) * len_q, h * dk:(h + 1) * dk]   # (Lq, dk)
            kb = k_pm[b * len_k:(b + 1) * len_k, h * dk:(h + 1) * dk]   # (Lk, dk)
            tile = mm(qb, kb, contract=(1, 1))                          # (Lq, Lk)
            scores_ref[pl.ds((h * sz_b + b) * len_q, len_q), :] = tile

    # ---- ONE batched softmax over all heads/batches (temperature = /8.0) ----
    scores = scores_ref[...] * (1.0 / 8.0)                  # (H*B*Lq, Lk)
    m = jnp.max(scores, axis=-1, keepdims=True)
    e = jnp.exp(scores - m)
    denom = jnp.sum(e, axis=-1, keepdims=True)
    if approx_reciprocal:
        p = e * pl.reciprocal(denom, approx=True)           # EUP slot
    else:
        p = e / denom

    if attn_ref is not None:
        attn_ref[...] = p                                   # single packed store

    p_m = to_mxu(p)

    # ---- PV matmuls, lane-packed into the merged-heads scratch ----
    # heads_ref[b*Lq + i, h*dv + j] == o_{h,b}[i, j]  (== reference head merge)
    for h in range(n_heads):
        for b in range(sz_b):
            pb = p_m[(h * sz_b + b) * len_q:(h * sz_b + b + 1) * len_q, :]   # (Lq, Lk)
            vb = v_pm[b * len_k:(b + 1) * len_k, h * dv:(h + 1) * dv]        # (Lk, dv)
            heads_ref[pl.ds(b * len_q, len_q), pl.ds(h * dv, dv)] = mm(pb, vb)

    # ---- ONE merged fc matmul + bias + dropout(identity) + residual ----
    y = mm(to_mxu(heads_ref[...]), wfc) + bfc_ref[...] + q2d        # (Mq, D)

    # ---- ONE LayerNorm over the full block + ONE full-tile store ----
    mean = jnp.mean(y, axis=-1, keepdims=True)
    var = jnp.mean((y - mean) ** 2, axis=-1, keepdims=True)         # biased (torch LN)
    yhat = (y - mean) * lax.rsqrt(var + 1e-5)
    out_ref[...] = (yhat * gamma_ref[...] + beta_ref[...]).astype(out_ref.dtype)


# --------------------------------------------------------------------------
# Module-level wrapper reproducing MultiHeadAttention.forward
# --------------------------------------------------------------------------
def multi_head_attention(params, q, k, v, *, return_attn=True,
                         mxu_dtype=jnp.float32, approx_reciprocal=True):
    n_heads, dk, dv = params["n_heads"], params["dk"], params["dv"]
    sz_b, len_q, d_models = q.shape
    _, len_k, _ = k.shape
    _, len_v, _ = v.shape
    assert len_v == len_k, "reference attention requires len_v == len_k"
    assert dk == dv, "reference forward projects V with w_ks, so dv must equal dk"

    Mq, Mk = sz_b * len_q, sz_b * len_k
    hdk = n_heads * dk

    q2d = q.reshape(Mq, d_models)
    k2d = k.reshape(Mk, d_models)
    v2d = v.reshape(Mk, d_models)

    def vec2d(x):
        return x.reshape(1, x.shape[-1])

    kernel = functools.partial(
        _mha_fused_kernel,
        n_heads=n_heads, sz_b=sz_b, len_q=len_q, len_k=len_k, dk=dk, dv=dv,
        mxu_dtype=mxu_dtype, return_attn=return_attn,
        approx_reciprocal=approx_reciprocal)

    def full2d(shape):
        return pl.BlockSpec(shape, lambda i: (0, 0))

    in_specs = [
        full2d((Mq, d_models)),             # q
        full2d((Mk, d_models)),             # k
        full2d((Mk, d_models)),             # v
        full2d((d_models, hdk)),            # w_qs
        full2d((1, hdk)),                   # b_qs
        full2d((d_models, hdk)),            # w_ks
        full2d((1, hdk)),                   # b_ks
        full2d((n_heads * dv, d_models)),   # w_fc
        full2d((1, d_models)),              # b_fc
        full2d((1, d_models)),              # ln_gamma
        full2d((1, d_models)),              # ln_beta
    ]
    out_shape = [jax.ShapeDtypeStruct((Mq, d_models), jnp.float32)]
    out_specs = [full2d((Mq, d_models))]
    if return_attn:
        out_shape.append(
            jax.ShapeDtypeStruct((n_heads * sz_b * len_q, len_k), jnp.float32))
        out_specs.append(full2d((n_heads * sz_b * len_q, len_k)))

    scratch_shapes = [
        pltpu.VMEM((n_heads * sz_b * len_q, len_k), jnp.float32),   # stacked scores
        pltpu.VMEM((Mq, n_heads * dv), jnp.float32),                # merged heads
    ]

    results = pl.pallas_call(
        kernel,
        out_shape=tuple(out_shape),
        grid=(1,),
        in_specs=in_specs,
        out_specs=tuple(out_specs),
        scratch_shapes=scratch_shapes,
        compiler_params=pltpu.CompilerParams(
            dimension_semantics=("arbitrary",)),
    )(q2d, k2d, v2d,
      params["w_qs"], vec2d(params["b_qs"]),
      params["w_ks"], vec2d(params["b_ks"]),
      params["w_fc"], vec2d(params["b_fc"]),
      vec2d(params["ln_gamma"]), vec2d(params["ln_beta"]))

    out = results[0].reshape(sz_b, len_q, d_models)
    if return_attn:
        attn = results[1].reshape(n_heads * sz_b, len_q, len_k)
        return out, attn
    return out


# --------------------------------------------------------------------------
# Pure-JAX reference (same math as the PyTorch module, bugs reproduced)
# --------------------------------------------------------------------------
def _mha_reference(params, q, k, v):
    H, dk, dv = params["n_heads"], params["dk"], params["dv"]
    B, Lq, D = q.shape
    _, Lk, _ = k.shape
    qp = q @ params["w_qs"] + params["b_qs"]
    kp = k @ params["w_ks"] + params["b_ks"]
    vp = v @ params["w_ks"] + params["b_ks"]          # reference bug: V uses w_ks
    qh = qp.reshape(B, Lq, H, dk).transpose(2, 0, 1, 3).reshape(H * B, Lq, dk)
    kh = kp.reshape(B, Lk, H, dk).transpose(2, 0, 1, 3).reshape(H * B, Lk, dk)
    vh = vp.reshape(B, Lk, H, dv).transpose(2, 0, 1, 3).reshape(H * B, Lk, dv)
    attn = jnp.einsum("nqd,nkd->nqk", qh, kh) / 8.0
    attn = jax.nn.softmax(attn, axis=-1)
    o = jnp.einsum("nqk,nkd->nqd", attn, vh)
    o = o.reshape(H, B, Lq, dv).transpose(1, 2, 0, 3).reshape(B, Lq, H * dv)
    y = o @ params["w_fc"] + params["b_fc"] + q
    mean = y.mean(-1, keepdims=True)
    var = ((y - mean) ** 2).mean(-1, keepdims=True)
    out = (y - mean) / jnp.sqrt(var + 1e-5) * params["ln_gamma"] + params["ln_beta"]
    return out, attn


# --------------------------------------------------------------------------
# Deterministic parameter construction (mirrors __init__ initializers)
# --------------------------------------------------------------------------
def init_params(key, n_heads, d_models, dk, dv):
    ks = jax.random.split(key, 8)
    std_qk = (2.0 / (d_models + dk)) ** 0.5
    std_v = (2.0 / (d_models + dv)) ** 0.5
    xavier_fc = (2.0 / (dk * n_heads + d_models)) ** 0.5
    return {
        "n_heads": n_heads, "dk": dk, "dv": dv,
        "w_qs": std_qk * jax.random.normal(ks[0], (d_models, n_heads * dk), jnp.float32),
        "b_qs": 0.01 * jax.random.normal(ks[1], (n_heads * dk,), jnp.float32),
        "w_ks": std_qk * jax.random.normal(ks[2], (d_models, n_heads * dk), jnp.float32),
        "b_ks": 0.01 * jax.random.normal(ks[3], (n_heads * dk,), jnp.float32),
        # w_vs is initialized in the reference module but never used in forward
        "w_vs": std_v * jax.random.normal(ks[4], (d_models, n_heads * dk), jnp.float32),
        "w_fc": xavier_fc * jax.random.normal(ks[5], (dk * n_heads, d_models), jnp.float32),
        "b_fc": 0.01 * jax.random.normal(ks[6], (d_models,), jnp.float32),
        "ln_gamma": jnp.ones((d_models,), jnp.float32),
        "ln_beta": jnp.zeros((d_models,), jnp.float32),
    }


if __name__ == "__main__":
    key = jax.random.PRNGKey(0)
    n_heads, d_models, dk, dv = 4, 32, 8, 8
    sz_b, seq = 2, 8

    kp, kq, kk, kv = jax.random.split(key, 4)
    params = init_params(kp, n_heads, d_models, dk, dv)
    q = jax.random.normal(kq, (sz_b, seq, d_models), jnp.float32)
    k = jax.random.normal(kk, (sz_b, seq, d_models), jnp.float32)
    v = jax.random.normal(kv, (sz_b, seq, d_models), jnp.float32)

    fn = jax.jit(functools.partial(multi_head_attention, params))
    out, attn = fn(q, k, v)
    jax.block_until_ready((out, attn))

    out_ref, attn_ref = _mha_reference(params, q, k, v)

    assert out.shape == (sz_b, seq, d_models)
    assert attn.shape == (n_heads * sz_b, seq, seq)
    assert bool(jnp.all(jnp.isfinite(out))) and bool(jnp.all(jnp.isfinite(attn)))
    assert bool(jnp.allclose(out, out_ref, atol=2e-2, rtol=2e-2))
    assert bool(jnp.allclose(attn, attn_ref, atol=2e-2, rtol=2e-2))
    print("KERNEL_OK")
</pallas_src>

<mosaic_0001>
module attributes {stable_mosaic.version = 11 : i64} {
  func.func @_mha_fused_kernel(%arg0: i32, %arg1: memref<16x32xf32, #tpu.memory_space<vmem>>, %arg2: memref<16x32xf32, #tpu.memory_space<vmem>>, %arg3: memref<16x32xf32, #tpu.memory_space<vmem>>, %arg4: memref<32x32xf32, #tpu.memory_space<vmem>>, %arg5: memref<1x32xf32, #tpu.memory_space<vmem>>, %arg6: memref<32x32xf32, #tpu.memory_space<vmem>>, %arg7: memref<1x32xf32, #tpu.memory_space<vmem>>, %arg8: memref<32x32xf32, #tpu.memory_space<vmem>>, %arg9: memref<1x32xf32, #tpu.memory_space<vmem>>, %arg10: memref<1x32xf32, #tpu.memory_space<vmem>>, %arg11: memref<1x32xf32, #tpu.memory_space<vmem>>, %arg12: memref<16x32xf32, #tpu.memory_space<vmem>>, %arg13: memref<64x8xf32, #tpu.memory_space<vmem>>, %arg14: memref<64x8xf32, #tpu.memory_space<vmem>>, %arg15: memref<16x32xf32, #tpu.memory_space<vmem>>) attributes {dimension_semantics = [#tpu.dimension_semantics<arbitrary>], iteration_bounds = array<i64: 1>, scalar_prefetch = 0 : i64, scratch_operands = 2 : i64, tpu.core_type = #tpu.core_type<tc>, window_params = [{pipeline_mode = #tpu.pipeline_mode<synchronous>, transform_indices = @transform_0, window_bounds = array<i64: 16, 32>}, {pipeline_mode = #tpu.pipeline_mode<synchronous>, transform_indices = @transform_1, window_bounds = array<i64: 16, 32>}, {pipeline_mode = #tpu.pipeline_mode<synchronous>, transform_indices = @transform_2, window_bounds = array<i64: 16, 32>}, {pipeline_mode = #tpu.pipeline_mode<synchronous>, transform_indices = @transform_3, window_bounds = array<i64: 32, 32>}, {pipeline_mode = #tpu.pipeline_mode<synchronous>, transform_indices = @transform_4, window_bounds = array<i64: 1, 32>}, {pipeline_mode = #tpu.pipeline_mode<synchronous>, transform_indices = @transform_5, window_bounds = array<i64: 32, 32>}, {pipeline_mode = #tpu.pipeline_mode<synchronous>, transform_indices = @transform_6, window_bounds = array<i64: 1, 32>}, {pipeline_mode = #tpu.pipeline_mode<synchronous>, transform_indices = @transform_7, window_bounds = array<i64: 32, 32>}, {pipeline_mode = #tpu.pipeline_mode<synchronous>, transform_indices = @transform_8, window_bounds = array<i64: 1, 32>}, {pipeline_mode = #tpu.pipeline_mode<synchronous>, transform_indices = @transform_9, window_bounds = array<i64: 1, 32>}, {pipeline_mode = #tpu.pipeline_mode<synchronous>, transform_indices = @transform_10, window_bounds = array<i64: 1, 32>}, {pipeline_mode = #tpu.pipeline_mode<synchronous>, transform_indices = @transform_11, window_bounds = array<i64: 16, 32>}, {pipeline_mode = #tpu.pipeline_mode<synchronous>, transform_indices = @transform_12, window_bounds = array<i64: 64, 8>}]} {
    %c0 = arith.constant 0 : index
    %c0_0 = arith.constant 0 : index
    %0 = vector.load %arg1[%c0, %c0_0] : memref<16x32xf32, #tpu.memory_space<vmem>>, vector<16x32xf32>
    %c0_1 = arith.constant 0 : index
    %c0_2 = arith.constant 0 : index
    %1 = vector.load %arg2[%c0_1, %c0_2] : memref<16x32xf32, #tpu.memory_space<vmem>>, vector<16x32xf32>
    %c0_3 = arith.constant 0 : index
    %c0_4 = arith.constant 0 : index
    %2 = vector.load %arg3[%c0_3, %c0_4] : memref<16x32xf32, #tpu.memory_space<vmem>>, vector<16x32xf32>
    %c0_5 = arith.constant 0 : index
    %c0_6 = arith.constant 0 : index
    %3 = vector.load %arg4[%c0_5, %c0_6] : memref<32x32xf32, #tpu.memory_space<vmem>>, vector<32x32xf32>
    %c0_7 = arith.constant 0 : index
    %c0_8 = arith.constant 0 : index
    %4 = vector.load %arg6[%c0_7, %c0_8] : memref<32x32xf32, #tpu.memory_space<vmem>>, vector<32x32xf32>
    %c0_9 = arith.constant 0 : index
    %c0_10 = arith.constant 0 : index
    %5 = vector.load %arg8[%c0_9, %c0_10] : memref<32x32xf32, #tpu.memory_space<vmem>>, vector<32x32xf32>
    %cst = arith.constant dense<0.000000e+00> : vector<16x32xf32>
    %6 = tpu.matmul %0, %3, %cst {dimension_numbers = #tpu.dot_dimension_numbers<[1], [0], [0], [1], [0, 0, 1, 1], [], []>} : vector<16x32xf32>, vector<32x32xf32>, vector<16x32xf32> -> vector<16x32xf32>
    %c0_11 = arith.constant 0 : index
    %c0_12 = arith.constant 0 : index
    %7 = vector.load %arg5[%c0_11, %c0_12] : memref<1x32xf32, #tpu.memory_space<vmem>>, vector<1x32xf32>
    %8 = vector.broadcast %7 : vector<1x32xf32> to vector<16x32xf32>
    %9 = arith.addf %6, %8 : vector<16x32xf32>
    %cst_13 = arith.constant dense<0.000000e+00> : vector<16x32xf32>
    %10 = tpu.matmul %1, %4, %cst_13 {dimension_numbers = #tpu.dot_dimension_numbers<[1], [0], [0], [1], [0, 0, 1, 1], [], []>} : vector<16x32xf32>, vector<32x32xf32>, vector<16x32xf32> -> vector<16x32xf32>
    %c0_14 = arith.constant 0 : index
    %c0_15 = arith.constant 0 : index
    %11 = vector.load %arg7[%c0_14, %c0_15] : memref<1x32xf32, #tpu.memory_space<vmem>>, vector<1x32xf32>
    %12 = vector.broadcast %11 : vector<1x32xf32> to vector<16x32xf32>
    %13 = arith.addf %10, %12 : vector<16x32xf32>
    %cst_16 = arith.constant dense<0.000000e+00> : vector<16x32xf32>
    %14 = tpu.matmul %2, %4, %cst_16 {dimension_numbers = #tpu.dot_dimension_numbers<[1], [0], [0], [1], [0, 0, 1, 1], [], []>} : vector<16x32xf32>, vector<32x32xf32>, vector<16x32xf32> -> vector<16x32xf32>
    %c0_17 = arith.constant 0 : index
    %c0_18 = arith.constant 0 : index
    %15 = vector.load %arg7[%c0_17, %c0_18] : memref<1x32xf32, #tpu.memory_space<vmem>>, vector<1x32xf32>
    %16 = vector.broadcast %15 : vector<1x32xf32> to vector<16x32xf32>
    %17 = arith.addf %14, %16 : vector<16x32xf32>
    %18 = vector.extract_strided_slice %9 {offsets = [0, 0], sizes = [8, 8], strides = [1, 1]} : vector<16x32xf32> to vector<8x8xf32>
    %19 = vector.extract_strided_slice %13 {offsets = [0, 0], sizes = [8, 8], strides = [1, 1]} : vector<16x32xf32> to vector<8x8xf32>
    %cst_19 = arith.constant dense<0.000000e+00> : vector<8x8xf32>
    %20 = tpu.matmul %18, %19, %cst_19 {dimension_numbers = #tpu.dot_dimension_numbers<[1], [1], [0], [0], [0, 0, 1, 0], [], []>} : vector<8x8xf32>, vector<8x8xf32>, vector<8x8xf32> -> vector<8x8xf32>
    %c0_20 = arith.constant 0 : index
    %c0_21 = arith.constant 0 : index
    %21 = vector.load %arg14[%c0_20, %c0_21] : memref<64x8xf32, #tpu.memory_space<vmem>>, vector<8x8xf32>
    tpu.vector_store %arg14[%c0_20, %c0_21], %20 {strides = array<i32>} : memref<64x8xf32, #tpu.memory_space<vmem>>, vector<8x8xf32>,
    %22 = vector.extract_strided_slice %9 {offsets = [8, 0], sizes = [8, 8], strides = [1, 1]} : vector<16x32xf32> to vector<8x8xf32>
    %23 = vector.extract_strided_slice %13 {offsets = [8, 0], sizes = [8, 8], strides = [1, 1]} : vector<16x32xf32> to vector<8x8xf32>
    %cst_22 = arith.constant dense<0.000000e+00> : vector<8x8xf32>
    %24 = tpu.matmul %22, %23, %cst_22 {dimension_numbers = #tpu.dot_dimension_numbers<[1], [1], [0], [0], [0, 0, 1, 0], [], []>} : vector<8x8xf32>, vector<8x8xf32>, vector<8x8xf32> -> vector<8x8xf32>
    %c8 = arith.constant 8 : index
    %c0_23 = arith.constant 0 : index
    %25 = vector.load %arg14[%c8, %c0_23] : memref<64x8xf32, #tpu.memory_space<vmem>>, vector<8x8xf32>
    tpu.vector_store %arg14[%c8, %c0_23], %24 {strides = array<i32>} : memref<64x8xf32, #tpu.memory_space<vmem>>, vector<8x8xf32>,
    %26 = vector.extract_strided_slice %9 {offsets = [0, 8], sizes = [8, 8], strides = [1, 1]} : vector<16x32xf32> to vector<8x8xf32>
    %27 = vector.extract_strided_slice %13 {offsets = [0, 8], sizes = [8, 8], strides = [1, 1]} : vector<16x32xf32> to vector<8x8xf32>
    %cst_24 = arith.constant dense<0.000000e+00> : vector<8x8xf32>
    %28 = tpu.matmul %26, %27, %cst_24 {dimension_numbers = #tpu.dot_dimension_numbers<[1], [1], [0], [0], [0, 0, 1, 0], [], []>} : vector<8x8xf32>, vector<8x8xf32>, vector<8x8xf32> -> vector<8x8xf32>
    %c16 = arith.constant 16 : index
    %c0_25 = arith.constant 0 : index
    %29 = vector.load %arg14[%c16, %c0_25] : memref<64x8xf32, #tpu.memory_space<vmem>>, vector<8x8xf32>
    tpu.vector_store %arg14[%c16, %c0_25], %28 {strides = array<i32>} : memref<64x8xf32, #tpu.memory_space<vmem>>, vector<8x8xf32>,
    %30 = vector.extract_strided_slice %9 {offsets = [8, 8], sizes = [8, 8], strides = [1, 1]} : vector<16x32xf32> to vector<8x8xf32>
    %31 = vector.extract_strided_slice %13 {offsets = [8, 8], sizes = [8, 8], strides = [1, 1]} : vector<16x32xf32> to vector<8x8xf32>
    %cst_26 = arith.constant dense<0.000000e+00> : vector<8x8xf32>
    %32 = tpu.matmul %30, %31, %cst_26 {dimension_numbers = #tpu.dot_dimension_numbers<[1], [1], [0], [0], [0, 0, 1, 0], [], []>} : vector<8x8xf32>, vector<8x8xf32>, vector<8x8xf32> -> vector<8x8xf32>
    %c24 = arith.constant 24 : index
    %c0_27 = arith.constant 0 : index
    %33 = vector.load %arg14[%c24, %c0_27] : memref<64x8xf32, #tpu.memory_space<vmem>>, vector<8x8xf32>
    tpu.vector_store %arg14[%c24, %c0_27], %32 {strides = array<i32>} : memref<64x8xf32, #tpu.memory_space<vmem>>, vector<8x8xf32>,
    %34 = vector.extract_strided_slice %9 {offsets = [0, 16], sizes = [8, 8], strides = [1, 1]} : vector<16x32xf32> to vector<8x8xf32>
    %35 = vector.extract_strided_slice %13 {offsets = [0, 16], sizes = [8, 8], strides = [1, 1]} : vector<16x32xf32> to vector<8x8xf32>
    %cst_28 = arith.constant dense<0.000000e+00> : vector<8x8xf32>
    %36 = tpu.matmul %34, %35, %cst_28 {dimension_numbers = #tpu.dot_dimension_numbers<[1], [1], [0], [0], [0, 0, 1, 0], [], []>} : vector<8x8xf32>, vector<8x8xf32>, vector<8x8xf32> -> vector<8x8xf32>
    %c32 = arith.constant 32 : index
    %c0_29 = arith.constant 0 : index
    %37 = vector.load %arg14[%c32, %c0_29] : memref<64x8xf32, #tpu.memory_space<vmem>>, vector<8x8xf32>
    tpu.vector_store %arg14[%c32, %c0_29], %36 {strides = array<i32>} : memref<64x8xf32, #tpu.memory_space<vmem>>, vector<8x8xf32>,
    %38 = vector.extract_strided_slice %9 {offsets = [8, 16], sizes = [8, 8], strides = [1, 1]} : vector<16x32xf32> to vector<8x8xf32>
    %39 = vector.extract_strided_slice %13 {offsets = [8, 16], sizes = [8, 8], strides = [1, 1]} : vector<16x32xf32> to vector<8x8xf32>
    %cst_30 = arith.constant dense<0.000000e+00> : vector<8x8xf32>
    %40 = tpu.matmul %38, %39, %cst_30 {dimension_numbers = #tpu.dot_dimension_numbers<[1], [1], [0], [0], [0, 0, 1, 0], [], []>} : vector<8x8xf32>, vector<8x8xf32>, vector<8x8xf32> -> vector<8x8xf32>
    %c40 = arith.constant 40 : index
    %c0_31 = arith.constant 0 : index
    %41 = vector.load %arg14[%c40, %c0_31] : memref<64x8xf32, #tpu.memory_space<vmem>>, vector<8x8xf32>
    tpu.vector_store %arg14[%c40, %c0_31], %40 {strides = array<i32>} : memref<64x8xf32, #tpu.memory_space<vmem>>, vector<8x8xf32>,
    %42 = vector.extract_strided_slice %9 {offsets = [0, 24], sizes = [8, 8], strides = [1, 1]} : vector<16x32xf32> to vector<8x8xf32>
    %43 = vector.extract_strided_slice %13 {offsets = [0, 24], sizes = [8, 8], strides = [1, 1]} : vector<16x32xf32> to vector<8x8xf32>
    %cst_32 = arith.constant dense<0.000000e+00> : vector<8x8xf32>
    %44 = tpu.matmul %42, %43, %cst_32 {dimension_numbers = #tpu.dot_dimension_numbers<[1], [1], [0], [0], [0, 0, 1, 0], [], []>} : vector<8x8xf32>, vector<8x8xf32>, vector<8x8xf32> -> vector<8x8xf32>
    %c48 = arith.constant 48 : index
    %c0_33 = arith.constant 0 : index
    %45 = vector.load %arg14[%c48, %c0_33] : memref<64x8xf32, #tpu.memory_space<vmem>>, vector<8x8xf32>
    tpu.vector_store %arg14[%c48, %c0_33], %44 {strides = array<i32>} : memref<64x8xf32, #tpu.memory_space<vmem>>, vector<8x8xf32>,
    %46 = vector.extract_strided_slice %9 {offsets = [8, 24], sizes = [8, 8], strides = [1, 1]} : vector<16x32xf32> to vector<8x8xf32>
    %47 = vector.extract_strided_slice %13 {offsets = [8, 24], sizes = [8, 8], strides = [1, 1]} : vector<16x32xf32> to vector<8x8xf32>
    %cst_34 = arith.constant dense<0.000000e+00> : vector<8x8xf32>
    %48 = tpu.matmul %46, %47, %cst_34 {dimension_numbers = #tpu.dot_dimension_numbers<[1], [1], [0], [0], [0, 0, 1, 0], [], []>} : vector<8x8xf32>, vector<8x8xf32>, vector<8x8xf32> -> vector<8x8xf32>
    %c56 = arith.constant 56 : index
    %c0_35 = arith.constant 0 : index
    %49 = vector.load %arg14[%c56, %c0_35] : memref<64x8xf32, #tpu.memory_space<vmem>>, vector<8x8xf32>
    tpu.vector_store %arg14[%c56, %c0_35], %48 {strides = array<i32>} : memref<64x8xf32, #tpu.memory_space<vmem>>, vector<8x8xf32>,
    %c0_36 = arith.constant 0 : index
    %c0_37 = arith.constant 0 : index
    %50 = vector.load %arg14[%c0_36, %c0_37] : memref<64x8xf32, #tpu.memory_space<vmem>>, vector<64x8xf32>
    %cst_38 = arith.constant 1.250000e-01 : f32
    %51 = vector.broadcast %cst_38 : f32 to vector<64x8xf32>
    %52 = arith.mulf %50, %51 : vector<64x8xf32>
    %cst_39 = arith.constant dense<0xFF800000> : vector<64xf32>
    %53 = vector.multi_reduction <maximumf>, %52, %cst_39 [1] : vector<64x8xf32> to vector<64xf32>
    %54 = vector.shape_cast %53 : vector<64xf32> to vector<64x1xf32>
    %55 = vector.broadcast %54 : vector<64x1xf32> to vector<64x8xf32>
    %56 = arith.subf %52, %55 : vector<64x8xf32>
    %57 = math.exp %56 : vector<64x8xf32>
    %cst_40 = arith.constant dense<0.000000e+00> : vector<64xf32>
    %58 = vector.multi_reduction <add>, %57, %cst_40 [1] : vector<64x8xf32> to vector<64xf32>
    %59 = vector.shape_cast %58 : vector<64xf32> to vector<64x1xf32>
    %60 = tpu.reciprocal %59 {approx = true} : vector<64x1xf32> -> vector<64x1xf32>
    %61 = vector.broadcast %60 : vector<64x1xf32> to vector<64x8xf32>
    %62 = arith.mulf %57, %61 : vector<64x8xf32>
    %c0_41 = arith.constant 0 : index
    %c0_42 = arith.constant 0 : index
    %63 = vector.load %arg13[%c0_41, %c0_42] : memref<64x8xf32, #tpu.memory_space<vmem>>, vector<64x8xf32>
    tpu.vector_store %arg13[%c0_41, %c0_42], %62 {strides = array<i32>} : memref<64x8xf32, #tpu.memory_space<vmem>>, vector<64x8xf32>,
    %64 = vector.extract_strided_slice %62 {offsets = [0, 0], sizes = [8, 8], strides = [1, 1]} : vector<64x8xf32> to vector<8x8xf32>
    %65 = vector.extract_strided_slice %17 {offsets = [0, 0], sizes = [8, 8], strides = [1, 1]} : vector<16x32xf32> to vector<8x8xf32>
    %cst_43 = arith.constant dense<0.000000e+00> : vector<8x8xf32>
    %66 = tpu.matmul %64, %65, %cst_43 {dimension_numbers = #tpu.dot_dimension_numbers<[1], [0], [0], [1], [0, 0, 1, 1], [], []>} : vector<8x8xf32>, vector<8x8xf32>, vector<8x8xf32> -> vector<8x8xf32>
    %c0_44 = arith.constant 0 : index
    %c0_45 = arith.constant 0 : index
    %67 = vector.load %arg15[%c0_44, %c0_45] : memref<16x32xf32, #tpu.memory_space<vmem>>, vector<8x8xf32>
    tpu.vector_store %arg15[%c0_44, %c0_45], %66 {strides = array<i32>} : memref<16x32xf32, #tpu.memory_space<vmem>>, vector<8x8xf32>,
    %68 = vector.extract_strided_slice %62 {offsets = [8, 0], sizes = [8, 8], strides = [1, 1]} : vector<64x8xf32> to vector<8x8xf32>
    %69 = vector.extract_strided_slice %17 {offsets = [8, 0], sizes = [8, 8], strides = [1, 1]} : vector<16x32xf32> to vector<8x8xf32>
    %cst_46 = arith.constant dense<0.000000e+00> : vector<8x8xf32>
    %70 = tpu.matmul %68, %69, %cst_46 {dimension_numbers = #tpu.dot_dimension_numbers<[1], [0], [0], [1], [0, 0, 1, 1], [], []>} : vector<8x8xf32>, vector<8x8xf32>, vector<8x8xf32> -> vector<8x8xf32>
    %c8_47 = arith.constant 8 : index
    %c0_48 = arith.constant 0 : index
    %71 = vector.load %arg15[%c8_47, %c0_48] : memref<16x32xf32, #tpu.memory_space<vmem>>, vector<8x8xf32>
    tpu.vector_store %arg15[%c8_47, %c0_48], %70 {strides = array<i32>} : memref<16x32xf32, #tpu.memory_space<vmem>>, vector<8x8xf32>,
    %72 = vector.extract_strided_slice %62 {offsets = [16, 0], sizes = [8, 8], strides = [1, 1]} : vector<64x8xf32> to vector<8x8xf32>
    %73 = vector.extract_strided_slice %17 {offsets = [0, 8], sizes = [8, 8], strides = [1, 1]} : vector<16x32xf32> to vector<8x8xf32>
    %cst_49 = arith.constant dense<0.000000e+00> : vector<8x8xf32>
    %74 = tpu.matmul %72, %73, %cst_49 {dimension_numbers = #tpu.dot_dimension_numbers<[1], [0], [0], [1], [0, 0, 1, 1], [], []>} : vector<8x8xf32>, vector<8x8xf32>, vector<8x8xf32> -> vector<8x8xf32>
    %c0_50 = arith.constant 0 : index
    %c8_51 = arith.constant 8 : index
    %75 = vector.load %arg15[%c0_50, %c8_51] : memref<16x32xf32, #tpu.memory_space<vmem>>, vector<8x8xf32>
    tpu.vector_store %arg15[%c0_50, %c8_51], %74 {strides = array<i32>} : memref<16x32xf32, #tpu.memory_space<vmem>>, vector<8x8xf32>,
    %76 = vector.extract_strided_slice %62 {offsets = [24, 0], sizes = [8, 8], strides = [1, 1]} : vector<64x8xf32> to vector<8x8xf32>
    %77 = vector.extract_strided_slice %17 {offsets = [8, 8], sizes = [8, 8], strides = [1, 1]} : vector<16x32xf32> to vector<8x8xf32>
    %cst_52 = arith.constant dense<0.000000e+00> : vector<8x8xf32>
    %78 = tpu.matmul %76, %77, %cst_52 {dimension_numbers = #tpu.dot_dimension_numbers<[1], [0], [0], [1], [0, 0, 1, 1], [], []>} : vector<8x8xf32>, vector<8x8xf32>, vector<8x8xf32> -> vector<8x8xf32>
    %c8_53 = arith.constant 8 : index
    %c8_54 = arith.constant 8 : index
    %79 = vector.load %arg15[%c8_53, %c8_54] : memref<16x32xf32, #tpu.memory_space<vmem>>, vector<8x8xf32>
    tpu.vector_store %arg15[%c8_53, %c8_54], %78 {strides = array<i32>} : memref<16x32xf32, #tpu.memory_space<vmem>>, vector<8x8xf32>,
    %80 = vector.extract_strided_slice %62 {offsets = [32, 0], sizes = [8, 8], strides = [1, 1]} : vector<64x8xf32> to vector<8x8xf32>
    %81 = vector.extract_strided_slice %17 {offsets = [0, 16], sizes = [8, 8], strides = [1, 1]} : vector<16x32xf32> to vector<8x8xf32>
    %cst_55 = arith.constant dense<0.000000e+00> : vector<8x8xf32>
    %82 = tpu.matmul %80, %81, %cst_55 {dimension_numbers = #tpu.dot_dimension_numbers<[1], [0], [0], [1], [0, 0, 1, 1], [], []>} : vector<8x8xf32>, vector<8x8xf32>, vector<8x8xf32> -> vector<8x8xf32>
    %c0_56 = arith.constant 0 : index
    %c16_57 = arith.constant 16 : index
    %83 = vector.load %arg15[%c0_56, %c16_57] : memref<16x32xf32, #tpu.memory_space<vmem>>, vector<8x8xf32>
    tpu.vector_store %arg15[%c0_56, %c16_57], %82 {strides = array<i32>} : memref<16x32xf32, #tpu.memory_space<vmem>>, vector<8x8xf32>,
    %84 = vector.extract_strided_slice %62 {offsets = [40, 0], sizes = [8, 8], strides = [1, 1]} : vector<64x8xf32> to vector<8x8xf32>
    %85 = vector.extract_strided_slice %17 {offsets = [8, 16], sizes = [8, 8], strides = [1, 1]} : vector<16x32xf32> to vector<8x8xf32>
    %cst_58 = arith.constant dense<0.000000e+00> : vector<8x8xf32>
    %86 = tpu.matmul %84, %85, %cst_58 {dimension_numbers = #tpu.dot_dimension_numbers<[1], [0], [0], [1], [0, 0, 1, 1], [], []>} : vector<8x8xf32>, vector<8x8xf32>, vector<8x8xf32> -> vector<8x8xf32>
    %c8_59 = arith.constant 8 : index
    %c16_60 = arith.constant 16 : index
    %87 = vector.load %arg15[%c8_59, %c16_60] : memref<16x32xf32, #tpu.memory_space<vmem>>, vector<8x8xf32>
    tpu.vector_store %arg15[%c8_59, %c16_60], %86 {strides = array<i32>} : memref<16x32xf32, #tpu.memory_space<vmem>>, vector<8x8xf32>,
    %88 = vector.extract_strided_slice %62 {offsets = [48, 0], sizes = [8, 8], strides = [1, 1]} : vector<64x8xf32> to vector<8x8xf32>
    %89 = vector.extract_strided_slice %17 {offsets = [0, 24], sizes = [8, 8], strides = [1, 1]} : vector<16x32xf32> to vector<8x8xf32>
    %cst_61 = arith.constant dense<0.000000e+00> : vector<8x8xf32>
    %90 = tpu.matmul %88, %89, %cst_61 {dimension_numbers = #tpu.dot_dimension_numbers<[1], [0], [0], [1], [0, 0, 1, 1], [], []>} : vector<8x8xf32>, vector<8x8xf32>, vector<8x8xf32> -> vector<8x8xf32>
    %c0_62 = arith.constant 0 : index
    %c24_63 = arith.constant 24 : index
    %91 = vector.load %arg15[%c0_62, %c24_63] : memref<16x32xf32, #tpu.memory_space<vmem>>, vector<8x8xf32>
    tpu.vector_store %arg15[%c0_62, %c24_63], %90 {strides = array<i32>} : memref<16x32xf32, #tpu.memory_space<vmem>>, vector<8x8xf32>,
    %92 = vector.extract_strided_slice %62 {offsets = [56, 0], sizes = [8, 8], strides = [1, 1]} : vector<64x8xf32> to vector<8x8xf32>
    %93 = vector.extract_strided_slice %17 {offsets = [8, 24], sizes = [8, 8], strides = [1, 1]} : vector<16x32xf32> to vector<8x8xf32>
    %cst_64 = arith.constant dense<0.000000e+00> : vector<8x8xf32>
    %94 = tpu.matmul %92, %93, %cst_64 {dimension_numbers = #tpu.dot_dimension_numbers<[1], [0], [0], [1], [0, 0, 1, 1], [], []>} : vector<8x8xf32>, vector<8x8xf32>, vector<8x8xf32> -> vector<8x8xf32>
    %c8_65 = arith.constant 8 : index
    %c24_66 = arith.constant 24 : index
    %95 = vector.load %arg15[%c8_65, %c24_66] : memref<16x32xf32, #tpu.memory_space<vmem>>, vector<8x8xf32>
    tpu.vector_store %arg15[%c8_65, %c24_66], %94 {strides = array<i32>} : memref<16x32xf32, #tpu.memory_space<vmem>>, vector<8x8xf32>,
    %c0_67 = arith.constant 0 : index
    %c0_68 = arith.constant 0 : index
    %96 = vector.load %arg15[%c0_67, %c0_68] : memref<16x32xf32, #tpu.memory_space<vmem>>, vector<16x32xf32>
    %cst_69 = arith.constant dense<0.000000e+00> : vector<16x32xf32>
    %97 = tpu.matmul %96, %5, %cst_69 {dimension_numbers = #tpu.dot_dimension_numbers<[1], [0], [0], [1], [0, 0, 1, 1], [], []>} : vector<16x32xf32>, vector<32x32xf32>, vector<16x32xf32> -> vector<16x32xf32>
    %c0_70 = arith.constant 0 : index
    %c0_71 = arith.constant 0 : index
    %98 = vector.load %arg9[%c0_70, %c0_71] : memref<1x32xf32, #tpu.memory_space<vmem>>, vector<1x32xf32>
    %99 = vector.broadcast %98 : vector<1x32xf32> to vector<16x32xf32>
    %100 = arith.addf %97, %99 : vector<16x32xf32>
    %101 = arith.addf %100, %0 : vector<16x32xf32>
    %cst_72 = arith.constant dense<0.000000e+00> : vector<16xf32>
    %102 = vector.multi_reduction <add>, %101, %cst_72 [1] : vector<16x32xf32> to vector<16xf32>
    %103 = vector.shape_cast %102 : vector<16xf32> to vector<16x1xf32>
    %cst_73 = arith.constant 3.200000e+01 : f32
    %104 = vector.broadcast %cst_73 : f32 to vector<16x1xf32>
    %105 = arith.divf %103, %104 : vector<16x1xf32>
    %106 = vector.broadcast %105 : vector<16x1xf32> to vector<16x32xf32>
    %107 = arith.subf %101, %106 : vector<16x32xf32>
    %108 = arith.mulf %107, %107 : vector<16x32xf32>
    %cst_74 = arith.constant dense<0.000000e+00> : vector<16xf32>
    %109 = vector.multi_reduction <add>, %108, %cst_74 [1] : vector<16x32xf32> to vector<16xf32>
    %110 = vector.shape_cast %109 : vector<16xf32> to vector<16x1xf32>
    %cst_75 = arith.constant 3.200000e+01 : f32
    %111 = vector.broadcast %cst_75 : f32 to vector<16x1xf32>
    %112 = arith.divf %110, %111 : vector<16x1xf32>
    %113 = vector.broadcast %105 : vector<16x1xf32> to vector<16x32xf32>
    %114 = arith.subf %101, %113 : vector<16x32xf32>
    %cst_76 = arith.constant 9.99999974E-6 : f32
    %115 = vector.broadcast %cst_76 : f32 to vector<16x1xf32>
    %116 = arith.addf %112, %115 : vector<16x1xf32>
    %117 = math.rsqrt %116 : vector<16x1xf32>
    %118 = vector.broadcast %117 : vector<16x1xf32> to vector<16x32xf32>
    %119 = arith.mulf %114, %118 : vector<16x32xf32>
    %c0_77 = arith.constant 0 : index
    %c0_78 = arith.constant 0 : index
    %120 = vector.load %arg10[%c0_77, %c0_78] : memref<1x32xf32, #tpu.memory_space<vmem>>, vector<1x32xf32>
    %121 = vector.broadcast %120 : vector<1x32xf32> to vector<16x32xf32>
    %122 = arith.mulf %119, %121 : vector<16x32xf32>
    %c0_79 = arith.constant 0 : index
    %c0_80 = arith.constant 0 : index
    %123 = vector.load %arg11[%c0_79, %c0_80] : memref<1x32xf32, #tpu.memory_space<vmem>>, vector<1x32xf32>
    %124 = vector.broadcast %123 : vector<1x32xf32> to vector<16x32xf32>
    %125 = arith.addf %122, %124 : vector<16x32xf32>
    %c0_81 = arith.constant 0 : index
    %c0_82 = arith.constant 0 : index
    %126 = vector.load %arg12[%c0_81, %c0_82] : memref<16x32xf32, #tpu.memory_space<vmem>>, vector<16x32xf32>
    tpu.vector_store %arg12[%c0_81, %c0_82], %125 {strides = array<i32>} : memref<16x32xf32, #tpu.memory_space<vmem>>, vector<16x32xf32>,
    return
  }
  func.func @transform_0(%arg0: i32) -> (i32, i32) {
    %c0_i32 = arith.constant 0 : i32
    %c0_i32_0 = arith.constant 0 : i32
    %c0_i32_1 = arith.constant 0 : i32
    return %c0_i32, %c0_i32_0 : i32, i32
  }
  func.func @transform_1(%arg0: i32) -> (i32, i32) {
    %c0_i32 = arith.constant 0 : i32
    %c0_i32_0 = arith.constant 0 : i32
    %c0_i32_1 = arith.constant 0 : i32
    return %c0_i32, %c0_i32_0 : i32, i32
  }
  func.func @transform_2(%arg0: i32) -> (i32, i32) {
    %c0_i32 = arith.constant 0 : i32
    %c0_i32_0 = arith.constant 0 : i32
    %c0_i32_1 = arith.constant 0 : i32
    return %c0_i32, %c0_i32_0 : i32, i32
  }
  func.func @transform_3(%arg0: i32) -> (i32, i32) {
    %c0_i32 = arith.constant 0 : i32
    %c0_i32_0 = arith.constant 0 : i32
    %c0_i32_1 = arith.constant 0 : i32
    return %c0_i32, %c0_i32_0 : i32, i32
  }
  func.func @transform_4(%arg0: i32) -> (i32, i32) {
    %c0_i32 = arith.constant 0 : i32
    %c0_i32_0 = arith.constant 0 : i32
    %c0_i32_1 = arith.constant 0 : i32
    return %c0_i32, %c0_i32_0 : i32, i32
  }
  func.func @transform_5(%arg0: i32) -> (i32, i32) {
    %c0_i32 = arith.constant 0 : i32
    %c0_i32_0 = arith.constant 0 : i32
    %c0_i32_1 = arith.constant 0 : i32
    return %c0_i32, %c0_i32_0 : i32, i32
  }
  func.func @transform_6(%arg0: i32) -> (i32, i32) {
    %c0_i32 = arith.constant 0 : i32
    %c0_i32_0 = arith.constant 0 : i32
    %c0_i32_1 = arith.constant 0 : i32
    return %c0_i32, %c0_i32_0 : i32, i32
  }
  func.func @transform_7(%arg0: i32) -> (i32, i32) {
    %c0_i32 = arith.constant 0 : i32
    %c0_i32_0 = arith.constant 0 : i32
    %c0_i32_1 = arith.constant 0 : i32
    return %c0_i32, %c0_i32_0 : i32, i32
  }
  func.func @transform_8(%arg0: i32) -> (i32, i32) {
    %c0_i32 = arith.constant 0 : i32
    %c0_i32_0 = arith.constant 0 : i32
    %c0_i32_1 = arith.constant 0 : i32
    return %c0_i32, %c0_i32_0 : i32, i32
  }
  func.func @transform_9(%arg0: i32) -> (i32, i32) {
    %c0_i32 = arith.constant 0 : i32
    %c0_i32_0 = arith.constant 0 : i32
    %c0_i32_1 = arith.constant 0 : i32
    return %c0_i32, %c0_i32_0 : i32, i32
  }
  func.func @transform_10(%arg0: i32) -> (i32, i32) {
    %c0_i32 = arith.constant 0 : i32
    %c0_i32_0 = arith.constant 0 : i32
    %c0_i32_1 = arith.constant 0 : i32
    return %c0_i32, %c0_i32_0 : i32, i32
  }
  func.func @transform_11(%arg0: i32) -> (i32, i32) {
    %c0_i32 = arith.constant 0 : i32
    %c0_i32_0 = arith.constant 0 : i32
    %c0_i32_1 = arith.constant 0 : i32
    return %c0_i32, %c0_i32_0 : i32, i32
  }
  func.func @transform_12(%arg0: i32) -> (i32, i32) {
    %c0_i32 = arith.constant 0 : i32
    %c0_i32_0 = arith.constant 0 : i32
    %c0_i32_1 = arith.constant 0 : i32
    return %c0_i32, %c0_i32_0 : i32, i32
  }
}

</mosaic_0001>

<bundles_post_ra>
// kernel: multi_head_attention.1
= control target key start
LH: loop header
LB: loop body
LE: loop exit
PB: predicated region body
PF: predicated region fallthrough
CT: control target
= control target key end

     0   :  { %18 = vsyncpa [#allocation5], 0  ;;  %s2772_s0 = inlined_call_operand.vmem [shape: f32[16,32], index: 0, kind: input, shape index: {}]   ;;  %s2773_s1 = inlined_call_operand.hbm [shape: f32[16,32], index: 1, kind: input, shape index: {}]   ;;  %s2774_s2 = inlined_call_operand.hbm [shape: f32[16,32], index: 2, kind: input, shape index: {}]   ;;  %s2775_s3 = inlined_call_operand.hbm [shape: f32[32,32], index: 3, kind: input, shape index: {}]   ;;  %s2776_s4 = inlined_call_operand.vmem [shape: f32[1,32], index: 4, kind: input, shape index: {}]   ;;  %s2777_s5 = inlined_call_operand.hbm [shape: f32[32,32], index: 5, kind: input, shape index: {}]   ;;  %s2778_s6 = inlined_call_operand.vmem [shape: f32[1,32], index: 6, kind: input, shape index: {}]   ;;  %s2779_s7 = inlined_call_operand.vmem [shape: f32[32,32], index: 7, kind: input, shape index: {}]   ;;  %s2780_s8 = inlined_call_operand.vmem [shape: f32[1,32], index: 8, kind: input, shape index: {}]   ;;  %s2781_s9 = inlined_call_operand.vmem [shape: f32[1,32], index: 9, kind: input, shape index: {}]   ;;  %s2782_s10 = inlined_call_operand.vmem [shape: f32[1,32], index: 10, kind: input, shape index: {}]   ;;  %s2783_s11 = inlined_call_operand.hbm [shape: f32[16,32], index: 11, kind: output, shape index: {0}]   ;;  %s2784_s12 = inlined_call_operand.hbm [shape: f32[64,8], index: 12, kind: output, shape index: {1}]  }
   0x1   :  { %19 = vsyncpa [#allocation8], 0 }
   0x2   :  { %20 = vsyncpa [#allocation11], 0 }
   0x3   :  { %21 = vsyncpa [#allocation6], 0 }
   0x4   :  { %22 = vsyncpa [#allocation14], 0  ;;  %s2369_s21 = smov [#allocation7]   ;;  %s2370_s23 = smov [#allocation4]  }
   0x5   :  { %s42_s22 = sshll.u32 %s2369_s21, 4  ;;  %s30_s24 = sshll.u32 %s2370_s23, 4  ;;  %s43_s22 = int_to_ptr.vmem [resolvable:$true] %s42_s22  ;;  %s2449_s24 = int_to_ptr.vmem [resolvable:$true] %s30_s24 }
   0x6   :  { %s2227_s27 = scalar_lea.hbm %s2774_s2, 256 }
   0x7   :  { %p2228_p0 = scmp.ne.s32.totalorder %s2774_s2, %s2227_s27  ;;  %p2231_p1 = scmp.lt.u32.totalorder %s2227_s27, %s2774_s2 }
   0x9   :  { %p2233_p2 = pnand %p2231_p1, %p2228_p0 }
   0xb   :  { %2236 = shalt.err (!%p2233_p2)
}
   0xc   :  { %s2237_s14 = scalar_lea.vmem %s43_s22, 256  ;;  %p2242_p4 = scmp.lt.s32.totalorder %s43_s22, %s43_s22 }
   0xd   :  { %p2238_p3 = scmp.ne.s32.totalorder %s43_s22, %s2237_s14  ;;  %p2243_p5 = scmp.lt.s32.totalorder %s2237_s14, %s2237_s14 }
   0xf   :  { %p2244_p6 = por %p2243_p5, %p2242_p4 }
  0x11   :  { %p2245_p7 = pnand %p2244_p6, %p2238_p3 }
  0x13   :  { %2248 = shalt.err (!%p2245_p7)
}
  0x14   :  { %s2371_s15 = smov 128   ;;  %s2372_s16 = smov 8  }
  0x15   :  { %48 = dma.hbm_to_vmem [thread:$0]  %s2774_s2, 256, %s43_s22, [#allocation8], %s2371_s15, %s2371_s15, %s2372_s16  }
  0x16   :  { %s2249_s21 = scalar_lea.hbm %s2773_s1, 256 }
  0x17   :  { %p2250_p8 = scmp.ne.s32.totalorder %s2773_s1, %s2249_s21  ;;  %p2253_p9 = scmp.lt.u32.totalorder %s2249_s21, %s2773_s1 }
  0x19   :  { %p2255_p10 = pnand %p2253_p9, %p2250_p8 }
  0x1b   :  { %2258 = shalt.err (!%p2255_p10)
}
  0x1c   :  { %s2259_s28 = scalar_lea.vmem %s2449_s24, 256  ;;  %p2264_p12 = scmp.lt.s32.totalorder %s2449_s24, %s2449_s24 }
  0x1d   :  { %p2260_p11 = scmp.ne.s32.totalorder %s2449_s24, %s2259_s28  ;;  %p2265_p13 = scmp.lt.s32.totalorder %s2259_s28, %s2259_s28 }
  0x1f   :  { %p2266_p0 = por %p2265_p13, %p2264_p12 }
  0x21   :  { %p2267_p1 = pnand %p2266_p0, %p2260_p11 }
  0x23   :  { %2270 = shalt.err (!%p2267_p1)
}
  0x24   :  { %36 = dma.hbm_to_vmem [thread:$0]  %s2773_s1, 256, %s2449_s24, [#allocation5], %s2371_s15, %s2371_s15, %s2372_s16  }
  0x25   :  { %s2373_s29 = smov [#allocation9]   ;;  %s2374_s13 = smov [#allocation10]  }
  0x26   :  { %s54_s30 = sshll.u32 %s2373_s29, 4  ;;  %s68_s14 = sshll.u32 %s2374_s13, 4  ;;  %s55_s30 = int_to_ptr.vmem [resolvable:$true] %s54_s30  ;;  %s2486_s14 = int_to_ptr.vmem [resolvable:$true] %s68_s14 }
  0x27   :  { %s2271_s19 = scalar_lea.hbm %s2775_s3, 512 }
  0x28   :  { %p2272_p2 = scmp.ne.s32.totalorder %s2775_s3, %s2271_s19  ;;  %p2275_p3 = scmp.lt.u32.totalorder %s2271_s19, %s2775_s3 }
  0x2a   :  { %p2277_p4 = pnand %p2275_p3, %p2272_p2 }
  0x2c   :  { %2280 = shalt.err (!%p2277_p4)
}
  0x2d   :  { %s2281_s1 = scalar_lea.vmem %s55_s30, 512  ;;  %p2286_p6 = scmp.lt.s32.totalorder %s55_s30, %s55_s30 }
  0x2e   :  { %p2282_p5 = scmp.ne.s32.totalorder %s55_s30, %s2281_s1  ;;  %p2287_p7 = scmp.lt.s32.totalorder %s2281_s1, %s2281_s1 }
  0x30   :  { %p2288_p8 = por %p2287_p7, %p2286_p6 }
  0x32   :  { %p2289_p9 = pnand %p2288_p8, %p2282_p5 }
  0x34   :  { %2292 = shalt.err (!%p2289_p9)
}
  0x35   :  { %60 = dma.hbm_to_vmem [thread:$0]  %s2775_s3, 512, %s55_s30, [#allocation8], %s2371_s15, %s2371_s15, %s2372_s16  }
  0x36   :  { %s2293_s2 = scalar_lea.hbm %s2777_s5, 512 }
  0x37   :  { %p2294_p10 = scmp.ne.s32.totalorder %s2777_s5, %s2293_s2  ;;  %p2297_p11 = scmp.lt.u32.totalorder %s2293_s2, %s2777_s5 }
  0x39   :  { %p2299_p12 = pnand %p2297_p11, %p2294_p10 }
  0x3b   :  { %2302 = shalt.err (!%p2299_p12)
}
  0x3c   :  { %s2303_s18 = scalar_lea.vmem %s2486_s14, 512  ;;  %p2308_p0 = scmp.lt.s32.totalorder %s2486_s14, %s2486_s14 }
  0x3d   :  { %p2304_p13 = scmp.ne.s32.totalorder %s2486_s14, %s2303_s18  ;;  %p2309_p1 = scmp.lt.s32.totalorder %s2303_s18, %s2303_s18 }
  0x3f   :  { %p2310_p2 = por %p2309_p1, %p2308_p0 }
  0x41   :  { %p2311_p3 = pnand %p2310_p2, %p2304_p13 }
  0x43   :  { %2314 = shalt.err (!%p2311_p3)
}
  0x44   :  { %74 = dma.hbm_to_vmem [thread:$0]  %s2777_s5, 512, %s2486_s14, [#allocation11], %s2371_s15, %s2371_s15, %s2372_s16  }
  0x45   :  { %2359 = dma.done.wait [#allocation5], 256  }
  0x46   :  { %2360 = vsyncadd [#allocation5], 4294967040 }
  0x47   :  { %2361 = dma.done.wait [#allocation8], 768  }
  0x48   :  { %2362 = vsyncadd [#allocation8], 4294966528 }
  0x49   :  { %2363 = dma.done.wait [#allocation11], 512  }
  0x4a   :  { %2364 = vsyncadd [#allocation11], 4294966784  ;;  %v107_v0 = vld [vmem:[#allocation10] sm:$0xff]  ;;  %v108_v1 = vld [vmem:[#allocation10 + $0x8] sm:$0xff]  ;;  %vm122_vm0 = vcmask 261120   ;;  %v2375_v16 = vmov 0.0  }
  0x4b   :  { %v103_v2 = vld [vmem:[#allocation9] sm:$0xff]  ;;  %v2152_v3 = vpack.c.bf16 %v108_v1, %v107_v0  ;;  %v104_v4 = vld [vmem:[#allocation9 + $0x8] sm:$0xff]  ;;  %v109_v5 = vld [vmem:[#allocation10 + $0x10] sm:$0xff]  ;;  %vm2376_vm1 = vmmov 0   ;;  %vm373_vm2 = vcmask 64512   ;;  %s2379_s1 = smov 104  }
  0x4c   :  { %v110_v6 = vld [vmem:[#allocation10 + $0x18] sm:$0xff]  ;;  %v2144_v7 = vpack.c.bf16 %v104_v4, %v103_v2  ;;  %v105_v9 = vld [vmem:[#allocation9 + $0x10] sm:$0xff]  ;;  %v99_v11 = vld [vmem:[#allocation4] sm:$0xff]  ;;  %s2380_s17 = smov 16   ;;  %s2381_s18 = smov 24   ;;  %vm1343_vm3 = vcmask 130112  }
  0x4d   :  { %v2156_v8 = vpack.c.bf16 %v110_v6, %v109_v5  ;;  %v106_v10 = vld [vmem:[#allocation9 + $0x18] sm:$0xff]  ;;  %2153 = vmatprep.subr.bf16.mxu1 %v2152_v3  ;;  %2039 = vmatprep.mubr.msk.f32.mxu1 %vm122_vm0, %v99_v11  ;;  %v2527_v13 = vld [vmem:[%s2772_s0] sm:$0xff]  ;;  %v100_v14 = vld [vmem:[#allocation4 + $0x8] sm:$0xff]  ;;  %vm1507_vm4 = vcmask 195712   ;;  %vm1670_vm5 = vcmask 261312  }
  0x4e   :  { %v2148_v12 = vpack.c.bf16 %v106_v10, %v105_v9  ;;  %2155 = vmatpush3.bf16.msra.mxu1 %v2152_v3  ;;  %2145 = vmatprep.subr.bf16.mxu0 %v2144_v7  ;;  %v2534_v15 = vld [vmem:[%s2772_s0 + $0x8] sm:$0xff]  ;;  %v101_v17 = vld [vmem:[#allocation7] sm:$0xff] }
  0x4f   :  { %2147 = vmatpush3.bf16.msra.mxu0 %v2144_v7  ;;  %2157 = vmatprep.subr.bf16.mxu1 %v2156_v8  ;;  %v2546_v18 = vld [vmem:[%s2778_s6] ss:$0 sm:$0xff]  ;;  %v102_v19 = vld [vmem:[#allocation7 + $0x8] sm:$0xff]  ;;  %s2377_s6 = smov 120  }
  0x50   :  { %2149 = vmatprep.subr.bf16.mxu0 %v2148_v12  ;;  %2028 = vmatprep.mubr.msk.f32.mxu0 %vm122_vm0, %v2527_v13  ;;  %v1927_v21 = vld [vmem:[%s2776_s4] ss:$0 sm:$0xff]  ;;  %s2378_s4 = smov 112  }
  0x52   :  { %2159 = vmatpush3.bf16.msra.mxu1 %v2156_v8 }
  0x53   :  { %2151 = vmatpush3.bf16.msra.mxu0 %v2148_v12  ;;  %2053 = vmatprep.subr.mxu1 %v2375_v16 }
  0x54   :  { %2161 = vmatprep.subr.bf16.mxu0 %v2152_v3 }
  0x55   :  { %2040 = vmatmul.mubr.msk.f32.vlgmr.msra.gmra.mrb[0].mxu1 %vm122_vm0, %v100_v14 }
  0x56   :  { %2029 = vmatmul.mubr.msk.f32.vlgmr.msra.gmra.mrb[0].mxu0 %vm122_vm0, %v2534_v15  ;;  %2055 = vmatprep.mubr.msk.f32.mxu1 %vm2376_vm1, %v2375_v16 }
  0x57   :  { %2163 = vmatpush3.bf16.msra.mxu0 %v2152_v3  ;;  %2050 = vmatprep.mubr.msk.f32.mxu0 %vm122_vm0, %v101_v17 }
  0x58   :  { %2165 = vmatprep.subr.bf16.mxu0 %v2156_v8 }
  0x5b   :  { %2167 = vmatpush3.bf16.msra.mxu0 %v2156_v8 }
  0x5c   :  { %2073 = vmatprep.subr.mxu0 %v2375_v16 }
  0x5e   :  { %2051 = vmatmul.mubr.msk.f32.vlgmr.msra.gmra.mrb[2].mxu0 %vm122_vm0, %v102_v19 }
  0x5f   :  { %2075 = vmatprep.mubr.msk.f32.mxu0 %vm2376_vm1, %v2375_v16 }
 0x128   :  { %v2041_v20 = vpop.f32.mrb[0].mxu1 }
 0x129   :  { %v289_v22 = vadd.f32 %v2041_v20, %v2546_v18  ;;  %v283_v23 = vpop.f32.mrb[1].mxu1  ;;  %v2030_v24 = vpop.f32.mrb[0].mxu0 }
 0x12a   :  { %v284_v25 = vadd.f32 %v2546_v18, %v283_v23  ;;  %v195_v26 = vpop.f32.mrb[1].mxu0  ;;  %v201_v27 = vadd.f32 %v2030_v24, %v1927_v21 }
 0x12b   :  { %609 = vrot.lane.b32.xlu1 %v289_v22, %s2377_s6  ;;  %v196_v28 = vadd.f32 %v1927_v21, %v195_v26 }
 0x12c   :  { %530 = vrot.lane.b32.xlu0 %v284_v25, %s2377_s6  ;;  %2054 = vmatpush3.xpose.msk.msra.mxu1 %vm373_vm2, %v284_v25 }
 0x12d   :  { %2058 = vmatprep.subr.mxu1 %v2375_v16 }
 0x12f   :  { %607 = vrot.lane.b32.xlu1 %v201_v27, %s2377_s6  ;;  %2056 = vmatmul.mubr.msk.f32.vlgmr.msra.gmra.mrb[2].mxu1 %vm373_vm2, %v196_v28 }
 0x130   :  { %528 = vrot.lane.b32.xlu0 %v196_v28, %s2377_s6  ;;  %2059 = vmatpush3.xpose.msk.msra.mxu1 %vm373_vm2, %v289_v22 }
 0x131   :  { %2060 = vmatprep.mubr.msk.f32.mxu1 %vm2376_vm1, %v2375_v16  ;;  %2063 = vmatprep.subr.mxu1 %v2375_v16  ;;  %v2052_v41 = vpop.f32.mrb[2].mxu0 }
 0x132   :  { %v2610_v42 = vadd.f32 %v2052_v41, %v2546_v18  ;;  %v364_v43 = vpop.f32.mrb[3].mxu0 }
 0x133   :  { %767 = vrot.lane.b32.xlu1 %v289_v22, %s2378_s4  ;;  %2061 = vmatmul.mubr.msk.f32.vlgmr.msra.gmra.mrb[4].mxu1 %vm373_vm2, %v201_v27  ;;  %v2613_v44 = vadd.f32 %v2546_v18, %v364_v43 }
 0x134   :  { %688 = vrot.lane.b32.xlu0 %v284_v25, %s2378_s4  ;;  %2065 = vmatprep.mubr.msk.f32.mxu1 %vm2376_vm1, %v2375_v16 }
 0x137   :  { %765 = vrot.lane.b32.xlu1 %v201_v27, %s2378_s4 }
 0x138   :  { %686 = vrot.lane.b32.xlu0 %v196_v28, %s2378_s4 }
 0x13b   :  { %925 = vrot.lane.b32.xlu1 %v289_v22, %s2379_s1 }
 0x13c   :  { %846 = vrot.lane.b32.xlu0 %v284_v25, %s2379_s1 }
 0x13f   :  { %923 = vrot.lane.b32.xlu1 %v201_v27, %s2379_s1 }
 0x140   :  { %844 = vrot.lane.b32.xlu0 %v196_v28, %s2379_s1 }
 0x19d   :  { %v610_v29 = vpop.permute.xlu1 %609 }
 0x19e   :  { %v531_v30 = vpop.permute.xlu0 %530 }
 0x19f   :  { %2064 = vmatpush3.xpose.msk.msra.mxu1 %vm373_vm2, %v531_v30 }
 0x1a0   :  { %2068 = vmatprep.subr.mxu1 %v2375_v16 }
 0x1a1   :  { %v608_v31 = vpop.permute.xlu1 %607 }
 0x1a2   :  { %v529_v32 = vpop.permute.xlu0 %528 }
 0x1a3   :  { %2066 = vmatmul.mubr.msk.f32.vlgmr.msra.gmra.mrb[6].mxu1 %vm373_vm2, %v529_v32 }
 0x1a4   :  { %2069 = vmatpush3.xpose.msk.msra.mxu1 %vm373_vm2, %v610_v29  ;;  %2070 = vmatprep.mubr.msk.f32.mxu1 %vm2376_vm1, %v2375_v16 }
 0x1a5   :  { %v768_v33 = vpop.permute.xlu1 %767  ;;  %2078 = vmatprep.subr.mxu1 %v2375_v16 }
 0x1a6   :  { %v689_v34 = vpop.permute.xlu0 %688 }
 0x1a7   :  { %2071 = vmatmul.mubr.msk.f32.vlgmr.msra.gmra.mrb[8].mxu1 %vm373_vm2, %v608_v31  ;;  %2074 = vmatpush3.xpose.msk.msra.mxu0 %vm373_vm2, %v689_v34 }
 0x1a8   :  { %2079 = vmatpush3.xpose.msk.msra.mxu1 %vm373_vm2, %v768_v33  ;;  %2080 = vmatprep.mubr.msk.f32.mxu1 %vm2376_vm1, %v2375_v16 }
 0x1a9   :  { %v766_v35 = vpop.permute.xlu1 %765  ;;  %2088 = vmatprep.subr.mxu1 %v2375_v16  ;;  %2083 = vmatprep.subr.mxu0 %v2375_v16 }
 0x1aa   :  { %v687_v36 = vpop.permute.xlu0 %686 }
 0x1ab   :  { %2076 = vmatmul.mubr.msk.f32.vlgmr.msra.gmra.mrb[4].mxu0 %vm373_vm2, %v687_v36  ;;  %2081 = vmatmul.mubr.msk.f32.vlgmr.msra.gmra.mrb[10].mxu1 %vm373_vm2, %v766_v35 }
 0x1ac   :  { %2090 = vmatprep.mubr.msk.f32.mxu1 %vm2376_vm1, %v2375_v16  ;;  %2085 = vmatprep.mubr.msk.f32.mxu0 %vm2376_vm1, %v2375_v16 }
 0x1ad   :  { %v926_v37 = vpop.permute.xlu1 %925 }
 0x1ae   :  { %v847_v38 = vpop.permute.xlu0 %846  ;;  %2089 = vmatpush3.xpose.msk.msra.mxu1 %vm373_vm2, %v926_v37 }
 0x1af   :  { %2084 = vmatpush3.xpose.msk.msra.mxu0 %vm373_vm2, %v847_v38  ;;  %2098 = vmatprep.subr.mxu1 %v2375_v16 }
 0x1b0   :  { %2093 = vmatprep.subr.mxu0 %v2375_v16 }
 0x1b1   :  { %v924_v39 = vpop.permute.xlu1 %923 }
 0x1b2   :  { %v845_v40 = vpop.permute.xlu0 %844  ;;  %2091 = vmatmul.mubr.msk.f32.vlgmr.msra.gmra.mrb[12].mxu1 %vm373_vm2, %v924_v39 }
 0x1b3   :  { %2086 = vmatmul.mubr.msk.f32.vlgmr.msra.gmra.mrb[6].mxu0 %vm373_vm2, %v845_v40  ;;  %2100 = vmatprep.mubr.msk.f32.mxu1 %vm2376_vm1, %v2375_v16 }
 0x1b4   :  { %2095 = vmatprep.mubr.msk.f32.mxu0 %vm2376_vm1, %v2375_v16  ;;  %2099 = vmatpush3.msra.mxu1 %v2610_v42 }
 0x1b5   :  { %2094 = vmatpush3.msra.mxu0 %v2613_v44  ;;  %2108 = vmatprep.subr.mxu1 %v2375_v16 }
 0x1b6   :  { %2103 = vmatprep.subr.mxu0 %v2375_v16 }
 0x202   :  { %v446_v45 = vpop.f32.mrb[2].mxu1 }
 0x203   :  { %450 = vst.msk [vmem:[#allocation2] sm:$0xff] %vm373_vm2, %v446_v45  ;;  %v2057_v46 = vpop.f32.mrb[3].mxu1 }
 0x206   :  { %v523_v47 = vpop.f32.mrb[4].mxu1 }
 0x207   :  { %527 = vst.msk [vmem:[#allocation2 + $0x8] sm:$0xff] %vm373_vm2, %v523_v47  ;;  %v2062_v48 = vpop.f32.mrb[5].mxu1 }
 0x20a   :  { %v1002_v49 = vld [vmem:[#allocation2] sm:$0xff] }
 0x20b   :  { %v1010_v50 = vmul.f32 0.125, %v1002_v49 }
 0x20d   :  { %v1018_v51 = vsel %vm373_vm2, %v1010_v50, -inf }
 0x20e   :  { %1019 = vmax.xlane.f32.xlu0 %v1018_v51  ;;  %v1003_v52 = vld [vmem:[#allocation2 + $0x8] sm:$0xff] }
 0x20f   :  { %v1011_v53 = vmul.f32 0.125, %v1003_v52 }
 0x211   :  { %v1021_v54 = vsel %vm373_vm2, %v1011_v53, -inf }
 0x212   :  { %1022 = vmax.xlane.f32.xlu1 %v1021_v54 }
 0x276   :  { %v602_v55 = vpop.f32.mrb[6].mxu1 }
 0x277   :  { %606 = vst.msk [vmem:[#allocation2 + $0x10] sm:$0xff] %vm373_vm2, %v602_v55  ;;  %v2067_v56 = vpop.f32.mrb[7].mxu1 }
 0x27a   :  { %v681_v57 = vpop.f32.mrb[8].mxu1 }
 0x27b   :  { %685 = vst.msk [vmem:[#allocation2 + $0x18] sm:$0xff] %vm373_vm2, %v681_v57  ;;  %v2072_v58 = vpop.f32.mrb[9].mxu1 }
 0x27e   :  { %v760_v59 = vpop.f32.mrb[4].mxu0  ;;  %v839_v60 = vpop.f32.mrb[10].mxu1  ;;  %v1004_v61 = vld [vmem:[#allocation2 + $0x10] sm:$0xff] }
 0x27f   :  { %764 = vst.msk [vmem:[#allocation2 + $0x20] sm:$0xff] %vm373_vm2, %v760_v59  ;;  %843 = vst.msk [vmem:[#allocation2 + $0x28] sm:$0xff] %vm373_vm2, %v839_v60  ;;  %v2077_v62 = vpop.f32.mrb[5].mxu0  ;;  %v2082_v63 = vpop.f32.mrb[11].mxu1  ;;  %v1012_v0 = vmul.f32 0.125, %v1004_v61 }
 0x281   :  { %v1024_v1 = vsel %vm373_vm2, %v1012_v0, -inf }
 0x282   :  { %1025 = vmax.xlane.f32.xlu0 %v1024_v1  ;;  %v1005_v2 = vld [vmem:[#allocation2 + $0x18] sm:$0xff] }
 0x283   :  { %v1013_v3 = vmul.f32 0.125, %v1005_v2 }
 0x285   :  { %v997_v4 = vpop.f32.mrb[12].mxu1  ;;  %v1027_v5 = vsel %vm373_vm2, %v1013_v3, -inf }
 0x286   :  { %1001 = vst.msk [vmem:[#allocation2 + $0x38] sm:$0xff] %vm373_vm2, %v997_v4  ;;  %v918_v6 = vpop.f32.mrb[6].mxu0  ;;  %1028 = vmax.xlane.f32.xlu0 %v1027_v5  ;;  %v2092_v7 = vpop.f32.mrb[13].mxu1  ;;  %v1006_v8 = vld [vmem:[#allocation2 + $0x20] sm:$0xff]  ;;  %v1007_v9 = vld [vmem:[#allocation2 + $0x28] sm:$0xff] }
 0x287   :  { %922 = vst.msk [vmem:[#allocation2 + $0x30] sm:$0xff] %vm373_vm2, %v918_v6  ;;  %v2087_v10 = vpop.f32.mrb[7].mxu0  ;;  %v1014_v11 = vmul.f32 0.125, %v1006_v8  ;;  %v1015_v12 = vmul.f32 0.125, %v1007_v9 }
 0x289   :  { %v1030_v14 = vsel %vm373_vm2, %v1014_v11, -inf  ;;  %v1033_v17 = vsel %vm373_vm2, %v1015_v12, -inf }
 0x28a   :  { %1031 = vmax.xlane.f32.xlu1 %v1030_v14  ;;  %1034 = vmax.xlane.f32.xlu0 %v1033_v17 }
 0x28d   :  { %v1009_v18 = vld [vmem:[#allocation2 + $0x38] sm:$0xff] }
 0x28e   :  { %v1017_v19 = vmul.f32 0.125, %v1009_v18  ;;  %v1008_v20 = vld [vmem:[#allocation2 + $0x30] sm:$0xff] }
 0x28f   :  { %v1016_v21 = vmul.f32 0.125, %v1008_v20 }
 0x290   :  { %v1039_v22 = vsel %vm373_vm2, %v1017_v19, -inf }
 0x291   :  { %1040 = vmax.xlane.f32.xlu0 %v1039_v22  ;;  %v1036_v23 = vsel %vm373_vm2, %v1016_v21, -inf }
 0x292   :  { %1037 = vmax.xlane.f32.xlu1 %v1036_v23 }
 0x29b   :  { %v1020_v27 = vpop.xlane.xlu0 %1019 }
 0x29c   :  { %v1042_v28 = vsub.f32 %v1010_v50, %v1020_v27 }
 0x29e   :  { %v1050_v29 = vmul.f32 1.442695, %v1042_v28 }
 0x29f   :  { %v1023_v24 = vpop.xlane.xlu1 %1022 }
 0x2a0   :  { %v1043_v25 = vsub.f32 %v1011_v53, %v1023_v24 }
 0x2a2   :  { %v1052_v26 = vmul.f32 1.442695, %v1043_v25 }
 0x2a3   :  { %1263 = vrot.lane.b32.xlu1 %v2613_v44, %s2377_s6 }
 0x2a4   :  { %2191 = vpow2.f32 %v1052_v26 }
 0x2a5   :  { %2193 = vpow2.f32 %v1050_v29 }
 0x2a7   :  { %1427 = vrot.lane.b32.xlu1 %v2613_v44, %s2378_s4  ;;  %1346 = vrot.lane.b32.xlu0 %v2610_v42, %s2377_s6 }
 0x2ab   :  { %1509 = vrot.lane.b32.xlu1 %v2610_v42, %s2378_s4 }
 0x2ae   :  { %v2192_v30 = vpop.eup %2191 }
 0x2af   :  { %v1069_v31 = vsel %vm373_vm2, %v2192_v30, 0.0  ;;  %v2644_v32 = vpop.eup %2193 }
 0x2b0   :  { %v1066_v33 = vsel %vm373_vm2, %v2644_v32, 0.0 }
 0x2c6   :  { %1070 = vadd.xlane.f32.xlu0 %v1069_v31 }
 0x2cf   :  { %1067 = vadd.xlane.f32.xlu1 %v1066_v33 }
 0x30f   :  { %v1026_v34 = vpop.xlane.xlu0 %1025 }
 0x310   :  { %v1044_v35 = vsub.f32 %v1012_v0, %v1026_v34 }
 0x312   :  { %v1054_v36 = vmul.f32 1.442695, %v1044_v35 }
 0x313   :  { %v1029_v37 = vpop.xlane.xlu0 %1028 }
 0x314   :  { %2195 = vpow2.f32 %v1054_v36  ;;  %v1045_v38 = vsub.f32 %v1013_v3, %v1029_v37 }
 0x316   :  { %v1056_v39 = vmul.f32 1.442695, %v1045_v38 }
 0x317   :  { %v1032_v40 = vpop.xlane.xlu1 %1031  ;;  %v1035_v41 = vpop.xlane.xlu0 %1034 }
 0x318   :  { %2197 = vpow2.f32 %v1056_v39  ;;  %v1046_v43 = vsub.f32 %v1014_v11, %v1032_v40  ;;  %v1047_v45 = vsub.f32 %v1015_v12, %v1035_v41  ;;  %v111_v39 = vld [vmem:[%s2779_s7] sm:$0xff]  ;;  %v112_v40 = vld [vmem:[%s2779_s7 + $0x8] sm:$0xff]  ;;  %v113_v41 = vld [vmem:[%s2779_s7 + $0x10] sm:$0xff] }
 0x31a   :  { %v1058_v46 = vmul.f32 1.442695, %v1046_v43  ;;  %v1060_v47 = vmul.f32 1.442695, %v1047_v45  ;;  %v2168_v45 = vpack.c.bf16 %v112_v40, %v111_v39 }
 0x31c   :  { %2199 = vpow2.f32 %v1058_v46  ;;  %v114_v46 = vld [vmem:[%s2779_s7 + $0x18] sm:$0xff] }
 0x31d   :  { %2201 = vpow2.f32 %v1060_v47  ;;  %v2172_v47 = vpack.c.bf16 %v114_v46, %v113_v41 }
 0x31e   :  { %v2196_v48 = vpop.eup %2195  ;;  %v1041_v49 = vpop.xlane.xlu0 %1040 }
 0x31f   :  { %v1049_v50 = vsub.f32 %v1017_v19, %v1041_v49  ;;  %v1038_v51 = vpop.xlane.xlu1 %1037  ;;  %v1072_v52 = vsel %vm373_vm2, %v2196_v48, 0.0 }
 0x320   :  { %v1048_v53 = vsub.f32 %v1016_v21, %v1038_v51  ;;  %1073 = vadd.xlane.f32.xlu1 %v1072_v52 }
 0x321   :  { %v1064_v54 = vmul.f32 1.442695, %v1049_v50 }
 0x322   :  { %v2198_v55 = vpop.eup %2197  ;;  %v1062_v56 = vmul.f32 1.442695, %v1048_v53  ;;  %v1347_v3 = vpop.permute.xlu0 %1346 }
 0x323   :  { %2203 = vpow2.f32 %v1064_v54  ;;  %v1075_v57 = vsel %vm373_vm2, %v2198_v55, 0.0  ;;  %v1264_v2 = vpop.permute.xlu1 %1263 }
 0x324   :  { %2205 = vpow2.f32 %v1062_v56  ;;  %1076 = vadd.xlane.f32.xlu0 %v1075_v57 }
 0x326   :  { %v2650_v58 = vpop.eup %2199 }
 0x327   :  { %v2652_v59 = vpop.eup %2201  ;;  %v1078_v60 = vsel %vm373_vm2, %v2650_v58, 0.0  ;;  %v1428_v4 = vpop.permute.xlu1 %1427 }
 0x328   :  { %1079 = vadd.xlane.f32.xlu1 %v1078_v60  ;;  %v1081_v61 = vsel %vm373_vm2, %v2652_v59, 0.0 }
 0x329   :  { %1082 = vadd.xlane.f32.xlu0 %v1081_v61 }
 0x32b   :  { %v1510_v6 = vpop.permute.xlu1 %1509 }
 0x32d   :  { %v2658_v62 = vpop.eup %2203 }
 0x32e   :  { %v2660_v63 = vpop.eup %2205  ;;  %v1087_v0 = vsel %vm373_vm2, %v2658_v62, 0.0 }
 0x32f   :  { %1088 = vadd.xlane.f32.xlu0 %v1087_v0  ;;  %v1084_v1 = vsel %vm373_vm2, %v2660_v63, 0.0  ;;  %v1959_v0 = vld [vmem:[%s2780_s8] ss:$0 sm:$0xff]  ;;  %s2382_s8 = smov [#allocation13]  }
 0x330   :  { %1085 = vadd.xlane.f32.xlu1 %v1084_v1  ;;  %s1909_s30 = sshll.u32 %s2382_s8, 4  ;;  %s1910_s30 = int_to_ptr.vmem [resolvable:$true] %s1909_s30 }
 0x331   :  { %s2315_s5 = scalar_lea.vmem %s1910_s30, 1024  ;;  %p2320_p5 = scmp.lt.s32.totalorder %s1910_s30, %s1910_s30 }
 0x332   :  { %p2316_p4 = scmp.ne.s32.totalorder %s1910_s30, %s2315_s5  ;;  %p2321_p6 = scmp.lt.s32.totalorder %s2315_s5, %s2315_s5 }
 0x334   :  { %p2322_p7 = por %p2321_p6, %p2320_p5 }
 0x336   :  { %p2323_p8 = pnand %p2322_p7, %p2316_p4 }
 0x341   :  { %1672 = vrot.lane.b32.xlu1 %v2610_v42, %s2379_s1 }
 0x345   :  { %1590 = vrot.lane.b32.xlu0 %v2613_v44, %s2379_s1 }
 0x353   :  { %v1071_v5 = vpop.xlane.xlu0 %1070 }
 0x354   :  { %2207 = vrcp.f32 %v1071_v5 }
 0x35c   :  { %v1068_v7 = vpop.xlane.xlu1 %1067 }
 0x35d   :  { %2209 = vrcp.f32 %v1068_v7 }
 0x35e   :  { %v2208_v8 = vpop.eup %2207 }
 0x35f   :  { %v1099_v9 = vmul.f32 %v2208_v8, %v2192_v30 }
 0x361   :  { %1107 = vst.msk [vmem:[#allocation13 + $0x8] sm:$0xff] %vm373_vm2, %v1099_v9  ;;  %2101 = vmatmul.mubr.msk.f32.vlgmr.msra.gmra.mrb[14].mxu1 %vm373_vm2, %v1099_v9 }
 0x362   :  { %2109 = vmatpush3.msra.mxu1 %v1347_v3  ;;  %2110 = vmatprep.mubr.msk.f32.mxu1 %vm2376_vm1, %v2375_v16 }
 0x363   :  { %2118 = vmatprep.subr.mxu1 %v2375_v16 }
 0x367   :  { %v2210_v42 = vpop.eup %2209 }
 0x368   :  { %v1098_v44 = vmul.f32 %v2210_v42, %v2644_v32 }
 0x36a   :  { %1106 = vst.msk [vmem:[#allocation13] sm:$0xff] %vm373_vm2, %v1098_v44  ;;  %2096 = vmatmul.mubr.msk.f32.vlgmr.msra.gmra.mrb[8].mxu0 %vm373_vm2, %v1098_v44 }
 0x36b   :  { %2104 = vmatpush3.msra.mxu0 %v1264_v2  ;;  %2105 = vmatprep.mubr.msk.f32.mxu0 %vm2376_vm1, %v2375_v16 }
 0x36c   :  { %2113 = vmatprep.subr.mxu0 %v2375_v16 }
 0x3ad   :  { %v1074_v10 = vpop.xlane.xlu1 %1073 }
 0x3ae   :  { %2211 = vrcp.f32 %v1074_v10 }
 0x3b1   :  { %v1077_v11 = vpop.xlane.xlu0 %1076 }
 0x3b2   :  { %2213 = vrcp.f32 %v1077_v11 }
 0x3b5   :  { %v1080_v12 = vpop.xlane.xlu1 %1079 }
 0x3b6   :  { %2215 = vrcp.f32 %v1080_v12  ;;  %v1083_v14 = vpop.xlane.xlu0 %1082 }
 0x3b7   :  { %2217 = vrcp.f32 %v1083_v14 }
 0x3b8   :  { %v2212_v17 = vpop.eup %2211 }
 0x3b9   :  { %v1100_v18 = vmul.f32 %v2212_v17, %v2196_v48 }
 0x3bb   :  { %1108 = vst.msk [vmem:[#allocation13 + $0x10] sm:$0xff] %vm373_vm2, %v1100_v18  ;;  %2106 = vmatmul.mubr.msk.f32.vlgmr.msra.gmra.mrb[10].mxu0 %vm373_vm2, %v1100_v18 }
 0x3bc   :  { %v2214_v19 = vpop.eup %2213  ;;  %2114 = vmatpush3.msra.mxu0 %v1428_v4  ;;  %v1089_v20 = vpop.xlane.xlu0 %1088  ;;  %2115 = vmatprep.mubr.msk.f32.mxu0 %vm2376_vm1, %v2375_v16 }
 0x3bd   :  { %v1101_v21 = vmul.f32 %v2214_v19, %v2198_v55  ;;  %2219 = vrcp.f32 %v1089_v20  ;;  %v1086_v22 = vpop.xlane.xlu1 %1085  ;;  %2123 = vmatprep.subr.mxu0 %v2375_v16 }
 0x3be   :  { %2221 = vrcp.f32 %v1086_v22 }
 0x3bf   :  { %1109 = vst.msk [vmem:[#allocation13 + $0x18] sm:$0xff] %vm373_vm2, %v1101_v21  ;;  %2111 = vmatmul.mubr.msk.f32.vlgmr.msra.gmra.mrb[16].mxu1 %vm373_vm2, %v1101_v21 }
 0x3c0   :  { %v2216_v23 = vpop.eup %2215  ;;  %2119 = vmatpush3.msra.mxu1 %v1510_v6  ;;  %2120 = vmatprep.mubr.msk.f32.mxu1 %vm2376_vm1, %v2375_v16  ;;  %v1591_v28 = vpop.permute.xlu0 %1590 }
 0x3c1   :  { %v2218_v24 = vpop.eup %2217  ;;  %v1102_v25 = vmul.f32 %v2216_v23, %v2650_v58  ;;  %2128 = vmatprep.subr.mxu1 %v2375_v16  ;;  %v1673_v27 = vpop.permute.xlu1 %1672 }
 0x3c2   :  { %v1103_v26 = vmul.f32 %v2218_v24, %v2652_v59 }
 0x3c3   :  { %1110 = vst.msk [vmem:[#allocation13 + $0x20] sm:$0xff] %vm373_vm2, %v1102_v25  ;;  %2116 = vmatmul.mubr.msk.f32.vlgmr.msra.gmra.mrb[12].mxu0 %vm373_vm2, %v1102_v25 }
 0x3c4   :  { %1111 = vst.msk [vmem:[#allocation13 + $0x28] sm:$0xff] %vm373_vm2, %v1103_v26  ;;  %2121 = vmatmul.mubr.msk.f32.vlgmr.msra.gmra.mrb[18].mxu1 %vm373_vm2, %v1103_v26  ;;  %2124 = vmatpush3.msra.mxu0 %v1591_v28 }
 0x3c5   :  { %2129 = vmatpush3.msra.mxu1 %v1673_v27  ;;  %2130 = vmatprep.mubr.msk.f32.mxu1 %vm2376_vm1, %v2375_v16 }
 0x3c6   :  { %2125 = vmatprep.mubr.msk.f32.mxu0 %vm2376_vm1, %v2375_v16  ;;  %2169 = vmatprep.subr.bf16.mxu0 %v2168_v45 }
 0x3c7   :  { %v2220_v29 = vpop.eup %2219 }
 0x3c8   :  { %v2222_v30 = vpop.eup %2221  ;;  %v1105_v31 = vmul.f32 %v2220_v29, %v2658_v62 }
 0x3c9   :  { %v1104_v32 = vmul.f32 %v2222_v30, %v2660_v63 }
 0x3ca   :  { %1113 = vst.msk [vmem:[#allocation13 + $0x38] sm:$0xff] %vm373_vm2, %v1105_v31  ;;  %2131 = vmatmul.mubr.msk.f32.vlgmr.msra.gmra.mrb[20].mxu1 %vm373_vm2, %v1105_v31 }
 0x3cb   :  { %1112 = vst.msk [vmem:[#allocation13 + $0x30] sm:$0xff] %vm373_vm2, %v1104_v32  ;;  %2126 = vmatmul.mubr.msk.f32.vlgmr.msra.gmra.mrb[14].mxu0 %vm373_vm2, %v1104_v32 }
 0x3cc   :  { %2171 = vmatpush3.bf16.msra.mxu0 %v2168_v45 }
 0x3cd   :  { %2173 = vmatprep.subr.bf16.mxu0 %v2172_v47 }
 0x3d0   :  { %2175 = vmatpush3.bf16.msra.mxu0 %v2172_v47 }
 0x434   :  { %v1257_v33 = vpop.f32.mrb[14].mxu1 }
 0x435   :  { %1261 = vst.msk [vmem:[#allocation3 + $0x8] sm:$0xff] %vm373_vm2, %v1257_v33  ;;  %v2102_v34 = vpop.f32.mrb[15].mxu1 }
 0x43d   :  { %v1183_v35 = vpop.f32.mrb[8].mxu0 }
 0x43e   :  { %1187 = vst.msk [vmem:[#allocation3] sm:$0xff] %vm373_vm2, %v1183_v35  ;;  %v2097_v16 = vpop.f32.mrb[9].mxu0 }
 0x48e   :  { %v1335_v36 = vpop.f32.mrb[10].mxu0 }
 0x48f   :  { %v2107_v37 = vpop.f32.mrb[11].mxu0  ;;  %1340 = vrot.lane.b32.xlu0 %v1335_v36, %s2372_s16 }
 0x492   :  { %v1418_v38 = vpop.f32.mrb[16].mxu1 }
 0x493   :  { %1423 = vrot.lane.b32.xlu1 %v1418_v38, %s2372_s16  ;;  %v2112_v43 = vpop.f32.mrb[17].mxu1 }
 0x496   :  { %v1499_v48 = vpop.f32.mrb[12].mxu0 }
 0x497   :  { %v1581_v49 = vpop.f32.mrb[18].mxu1  ;;  %v2117_v50 = vpop.f32.mrb[13].mxu0  ;;  %1504 = vrot.lane.b32.xlu0 %v1499_v48, %s2380_s17 }
 0x498   :  { %1586 = vrot.lane.b32.xlu1 %v1581_v49, %s2380_s17  ;;  %v2122_v51 = vpop.f32.mrb[19].mxu1 }
 0x49d   :  { %v1744_v52 = vpop.f32.mrb[20].mxu1 }
 0x49e   :  { %v1662_v53 = vpop.f32.mrb[14].mxu0  ;;  %1749 = vrot.lane.b32.xlu1 %v1744_v52, %s2381_s18  ;;  %v2132_v54 = vpop.f32.mrb[21].mxu1 }
 0x49f   :  { %1667 = vrot.lane.b32.xlu0 %v1662_v53, %s2381_s18  ;;  %v2127_v55 = vpop.f32.mrb[15].mxu0 }
 0x501   :  { %v1341_v56 = vpop.permute.xlu0 %1340 }
 0x502   :  { %1344 = vst.msk [vmem:[#allocation3] sm:$0xff] %vm1343_vm3, %v1341_v56 }
 0x505   :  { %v1424_v57 = vpop.permute.xlu1 %1423 }
 0x506   :  { %1426 = vst.msk [vmem:[#allocation3 + $0x8] sm:$0xff] %vm1343_vm3, %v1424_v57 }
 0x509   :  { %v1505_v58 = vpop.permute.xlu0 %1504 }
 0x50a   :  { %1508 = vst.msk [vmem:[#allocation3] sm:$0xff] %vm1507_vm4, %v1505_v58  ;;  %v1587_v59 = vpop.permute.xlu1 %1586 }
 0x50b   :  { %1589 = vst.msk [vmem:[#allocation3 + $0x8] sm:$0xff] %vm1507_vm4, %v1587_v59 }
 0x510   :  { %v1750_v60 = vpop.permute.xlu1 %1749 }
 0x511   :  { %1752 = vst.msk [vmem:[#allocation3 + $0x8] sm:$0xff] %vm1670_vm5, %v1750_v60  ;;  %v1668_v61 = vpop.permute.xlu0 %1667 }
 0x512   :  { %1671 = vst.msk [vmem:[#allocation3] sm:$0xff] %vm1670_vm5, %v1668_v61 }
 0x518   :  { %v1754_v63 = vld [vmem:[#allocation3 + $0x8] sm:$0xff] }
 0x519   :  { %v1753_v62 = vld [vmem:[#allocation3] sm:$0xff] }
 0x51a   :  { %2141 = vmatprep.mubr.msk.f32.mxu0 %vm122_vm0, %v1753_v62 }
 0x51b   :  { %2142 = vmatmul.mubr.msk.f32.vlgmr.msra.gmra.mrb[16].mxu0 %vm122_vm0, %v1754_v63 }
 0x5ee   :  { %v2143_v1 = vpop.f32.mrb[16].mxu0 }
 0x5ef   :  { %v1840_v2 = vadd.f32 %v2143_v1, %v1959_v0  ;;  %v1834_v3 = vpop.f32.mrb[17].mxu0 }
 0x5f0   :  { %v1835_v4 = vadd.f32 %v1959_v0, %v1834_v3 }
 0x5f1   :  { %v1844_v5 = vadd.f32 %v1840_v2, %v2534_v15 }
 0x5f2   :  { %v1843_v6 = vadd.f32 %v1835_v4, %v2527_v13 }
 0x5f3   :  { %v1848_v7 = vsel %vm122_vm0, %v1844_v5, 0.0 }
 0x5f4   :  { %1849 = vadd.xlane.f32.xlu1 %v1848_v7  ;;  %v1845_v8 = vsel %vm122_vm0, %v1843_v6, 0.0 }
 0x5f5   :  { %1846 = vadd.xlane.f32.xlu0 %v1845_v8 }
 0x681   :  { %v1850_v9 = vpop.xlane.xlu1 %1849 }
 0x682   :  { %v1853_v42 = vmul.f32 0.03125, %v1850_v9  ;;  %v1847_v44 = vpop.xlane.xlu0 %1846 }
 0x683   :  { %v1852_v10 = vmul.f32 0.03125, %v1847_v44 }
 0x684   :  { %v1855_v11 = vsub.f32 %v1844_v5, %v1853_v42 }
 0x685   :  { %v1854_v12 = vsub.f32 %v1843_v6, %v1852_v10 }
 0x686   :  { %v1857_v18 = vmul.f32 %v1855_v11, %v1855_v11 }
 0x687   :  { %v1856_v14 = vmul.f32 %v1854_v12, %v1854_v12 }
 0x688   :  { %v1861_v15 = vsel %vm122_vm0, %v1857_v18, 0.0 }
 0x689   :  { %v1858_v17 = vsel %vm122_vm0, %v1856_v14, 0.0 }
 0x68a   :  { %1859 = vadd.xlane.f32.xlu0 %v1858_v17 }
 0x68e   :  { %1862 = vadd.xlane.f32.xlu0 %v1861_v15 }
 0x68f   :  { %2326 = shalt.err (!%p2323_p8)
}
 0x690   :  { %s2327_s20 = scalar_lea.hbm %s2784_s12, 1024 }
 0x691   :  { %p2328_p9 = scmp.ne.s32.totalorder %s2784_s12, %s2327_s20  ;;  %p2331_p10 = scmp.lt.u32.totalorder %s2327_s20, %s2784_s12 }
 0x693   :  { %p2333_p11 = pnand %p2331_p10, %p2328_p9 }
 0x695   :  { %2336 = shalt.err (!%p2333_p11)
}
 0x696   :  { %1915 = dma.vmem_to_hbm [thread:$0]  %s1910_s30, 1024, %s2784_s12, [#allocation14], %s2371_s15, %s2371_s15, %s2372_s16  }
 0x697   :  { %v1962_v25 = vld [vmem:[%s2781_s9] ss:$0 sm:$0xff]  ;;  %s2383_s12 = smov [#allocation12]  }
 0x698   :  { %v1963_v27 = vld [vmem:[%s2782_s10] ss:$0 sm:$0xff]  ;;  %s1897_s28 = sshll.u32 %s2383_s12, 4  ;;  %s1898_s28 = int_to_ptr.vmem [resolvable:$true] %s1897_s28 }
 0x699   :  { %s2337_s2 = scalar_lea.vmem %s1898_s28, 256  ;;  %p2342_p13 = scmp.lt.s32.totalorder %s1898_s28, %s1898_s28 }
 0x69a   :  { %p2338_p12 = scmp.ne.s32.totalorder %s1898_s28, %s2337_s2  ;;  %p2343_p0 = scmp.lt.s32.totalorder %s2337_s2, %s2337_s2 }
 0x69c   :  { %p2344_p1 = por %p2343_p0, %p2342_p13 }
 0x69e   :  { %p2345_p2 = pnand %p2344_p1, %p2338_p12 }
 0x717   :  { %v1860_v13 = vpop.xlane.xlu0 %1859 }
 0x718   :  { %v1864_v19 = vmul.f32 0.03125, %v1860_v13 }
 0x71a   :  { %v1866_v20 = vadd.f32 1e-05, %v1864_v19 }
 0x71b   :  { %v1863_v21 = vpop.xlane.xlu0 %1862 }
 0x71c   :  { %2223 = vrsqrt.f32 %v1866_v20  ;;  %v1865_v22 = vmul.f32 0.03125, %v1863_v21 }
 0x71e   :  { %v1867_v23 = vadd.f32 1e-05, %v1865_v22 }
 0x720   :  { %2225 = vrsqrt.f32 %v1867_v23 }
 0x726   :  { %v2224_v24 = vpop.eup %2223 }
 0x727   :  { %v1870_v26 = vmul.f32 %v2224_v24, %v1854_v12 }
 0x729   :  { %v1879_v28 = vmul.f32 %v1962_v25, %v1870_v26 }
 0x72a   :  { %v2226_v29 = vpop.eup %2225 }
 0x72b   :  { %v1871_v30 = vmul.f32 %v2226_v29, %v1855_v11  ;;  %v1888_v31 = vadd.f32 %v1963_v27, %v1879_v28 }
 0x72d   :  { %v1880_v32 = vmul.f32 %v1962_v25, %v1871_v30  ;;  %1890 = vst.msk [vmem:[#allocation12] sm:$0xff] %vm122_vm0, %v1888_v31 }
 0x72f   :  { %v1889_v33 = vadd.f32 %v1963_v27, %v1880_v32 }
 0x731   :  { %1891 = vst.msk [vmem:[#allocation12 + $0x8] sm:$0xff] %vm122_vm0, %v1889_v33 }
 0x732   :  { %2348 = shalt.err (!%p2345_p2)
}
 0x733   :  { %s2349_s22 = scalar_lea.hbm %s2783_s11, 256 }
 0x734   :  { %p2350_p3 = scmp.ne.s32.totalorder %s2783_s11, %s2349_s22  ;;  %p2353_p4 = scmp.lt.u32.totalorder %s2349_s22, %s2783_s11 }
 0x736   :  { %p2355_p5 = pnand %p2353_p4, %p2350_p3 }
 0x738   :  { %2358 = shalt.err (!%p2355_p5)
}
 0x739   :  { %1903 = dma.vmem_to_hbm [thread:$0]  %s1898_s28, 256, %s2783_s11, [#allocation6], %s2371_s15, %s2371_s15, %s2372_s16  }
 0x73a   :  { %2365 = dma.done.wait [#allocation6], 256  }
 0x73b   :  { %2366 = vsyncadd [#allocation6], 4294967040 }
 0x73c   :  { %2367 = dma.done.wait [#allocation14], 1024  }
 0x73d   :  { %2368 = vsyncadd [#allocation14], 4294966272 }
 0x73e   :  { %1922 = vsyncpa [#allocation5], 1 }
 0x73f   :  { %1923 = vsyncpa [#allocation8], 1 }
 0x740   :  { %1924 = vsyncpa [#allocation11], 1 }
 0x741   :  { %1925 = vsyncpa [#allocation6], 1 }
 0x742   :  { %1926 = vsyncpa [#allocation14], 1 }

</bundles_post_ra>
